<compile_context>
chip_gen: v7x
topology: tpu7x:2x2x1
jax: 0.10.0
libtpu: 0.0.40
codegen_flags: <defaults>
</compile_context>

<pallas_src>
import functools

import jax
import jax.numpy as jnp
from jax.experimental import pallas as pl
from jax.experimental.pallas import tpu as pltpu


def _round_up(x, m):
    return ((x + m - 1) // m) * m


def _maybe_vmem_limit(bytes_needed):
    """Explicit scoped-VMEM limit only when the smallest default (v5e: 16 MiB)
    could be exceeded; budget derived from the actual chip (v6e / v7x differ)."""
    if bytes_needed <= (12 << 20):
        return None
    try:
        cap = pltpu.get_tpu_info().vmem_capacity_bytes  # 128 MiB v5e/v6e, 64 MiB v7x
    except Exception:
        cap = 64 << 20
    return int(min(cap // 2, _round_up(2 * bytes_needed, 1 << 20)))


# ----------------------------------------------------------------------------
# Kernels
# ----------------------------------------------------------------------------
def _conv_bias_act_kernel(slope_ref, x_ref, w_ref, b_ref, o_ref):
    """Fused 3x3 valid conv (as KH banded matmuls) + bias + leaky/prelu, one image.

    x_ref: (H, W*C)           channel-last row slab of one image
    w_ref: (KH, W*C, Wo*OC)   banded (Toeplitz over w) weights, kw folded in
    b_ref: (1, Wo*OC)         bias broadcast over ow
    o_ref: (Ho, Wo*OC)
    """
    kh_taps = w_ref.shape[0]
    ho = o_ref.shape[0]
    acc = jnp.dot(x_ref[0:ho, :], w_ref[0], preferred_element_type=jnp.float32)
    for kh in range(1, kh_taps):                      # static unroll (KH == 3)
        acc = acc + jnp.dot(x_ref[kh:kh + ho, :], w_ref[kh],
                            preferred_element_type=jnp.float32)
    z = acc + b_ref[...]
    s = slope_ref[0]                                   # scalar-prefetched slope (SMEM)
    o_ref[...] = jnp.where(z > 0.0, z, s * z).astype(o_ref.dtype)


def _maxpool_act_kernel(slope_ref, x_ref, o_ref):
    """Max over 16 window rows (9 real + 7 of -inf) + activation, lane-dense out.

    One full-occupancy (half, tl) VPU maximum + one sublane XLU reduce instead of
    a serial chain of (1, tl) maxima."""
    kk = x_ref.shape[0]
    half = kk // 2
    m = jnp.maximum(x_ref[0:half, :], x_ref[half:kk, :])   # (8, tl) full-sublane VPU
    z = jnp.max(m, axis=0, keepdims=True)                  # (1, tl) sublane reduce
    s = slope_ref[0]
    o_ref[...] = jnp.where(z > 0.0, z, s * z)


# ----------------------------------------------------------------------------
# Wrappers
# ----------------------------------------------------------------------------
@functools.partial(jax.jit, static_argnames=("use_bf16", "nhwc_output"))
def conv2d_act_pallas(x, weight, bias, slope, *, use_bf16=True, nhwc_output=True):
    """Conv2d(C->OC, KHxKW, stride 1, valid) fused with leaky/prelu activation.

    No HBM im2col slab: x is re-laid-out once to (B, H, W*C) and the kw window is
    folded into a banded weight, so the kernel reads x's bytes, not 9x of them.
    """
    B, C, H, W = x.shape
    OC, IC, KH, KW = weight.shape
    assert C == IC
    Ho, Wo = H - KH + 1, W - KW + 1
    WC, WoOC = W * C, Wo * OC

    in_dtype = jnp.bfloat16 if use_bf16 else jnp.float32   # bf16 = native MXU input
    bytes_in = 2 if use_bf16 else 4

    # Single cheap pass over x itself (NCHW -> (B, H, W*C)); lane index = w*C + c.
    x_slab = x.transpose(0, 2, 3, 1).reshape(B, H, WC).astype(in_dtype)

    # Banded (Toeplitz over w) weight:
    #   wbig[kh, w*C + c, ow*OC + oc] = weight[oc, c, kh, w - ow]  if 0 <= w-ow < KW
    band = (jnp.arange(W)[:, None, None]
            == jnp.arange(Wo)[None, :, None] + jnp.arange(KW)[None, None, :]
            ).astype(weight.dtype)                                   # (W, Wo, KW)
    wt = weight.transpose(2, 3, 1, 0)                                # (KH, KW, C, OC)
    wbig = jnp.einsum("wok,hkcd->hwcod", band, wt).reshape(KH, WC, WoOC)
    wbig = wbig.astype(in_dtype)

    bias_big = jnp.tile(bias.astype(jnp.float32), Wo).reshape(1, WoOC)
    slope_arr = jnp.asarray(slope, jnp.float32).reshape(1)

    # TODO(synk): tile Ho (overlapping input-row windows) for images whose per-image
    # slab would not fit VMEM; unnecessary at Conv2d(10,10,3)-module scales.
    vmem_need = (2 * H * WC + KH * WC * WoOC) * bytes_in + (WoOC + 2 * Ho * WoOC) * 4

    cost = pl.CostEstimate(
        flops=2 * B * KH * Ho * WC * WoOC + 2 * B * Ho * WoOC,
        transcendentals=0,
        bytes_accessed=(B * H * WC + KH * WC * WoOC) * bytes_in
        + (WoOC + B * Ho * WoOC) * 4,
    )

    out = pl.pallas_call(
        _conv_bias_act_kernel,
        out_shape=jax.ShapeDtypeStruct((B, Ho, WoOC), jnp.float32),
        grid_spec=pltpu.PrefetchScalarGridSpec(
            num_scalar_prefetch=1,                      # slope lands in SMEM
            grid=(B,),                                   # one image per step; for
            in_specs=[                                   # B>=2 both v7x TCs get work
                pl.BlockSpec((None, H, WC), lambda b, s: (b, 0, 0)),
                pl.BlockSpec((KH, WC, WoOC), lambda b, s: (0, 0, 0)),
                pl.BlockSpec((1, WoOC), lambda b, s: (0, 0)),
            ],
            out_specs=pl.BlockSpec((None, Ho, WoOC), lambda b, s: (b, 0, 0)),
        ),
        compiler_params=pltpu.CompilerParams(
            dimension_semantics=("parallel",),
            vmem_limit_bytes=_maybe_vmem_limit(vmem_need),
        ),
        cost_estimate=cost,
    )(slope_arr, x_slab, wbig, bias_big)

    out = out.reshape(B, Ho, Wo, OC)                     # free split of the lane dim
    if nhwc_output:
        return out                                       # lane-dense; preferred
    return out.transpose(0, 3, 1, 2)                     # NCHW only for torch parity


@functools.partial(jax.jit, static_argnames=("pool", "stride"))
def maxpool_act_pallas(x, slope, *, pool=3, stride=3):
    """MaxPool2d(3) (stride == kernel) fused with leaky/prelu activation."""
    assert pool == stride, "reshape-based window extraction assumes stride == kernel"
    B, C, H, W = x.shape
    Ho = (H - pool) // stride + 1
    Wo = (W - pool) // stride + 1
    KK = pool * pool
    KKP = _round_up(KK, 16)                 # pad window rows to 2 f32 sublane-tiles
    M = B * C * Ho * Wo

    # Window axis LEADING; flattened (b, c, oh, ow) on the lane axis.
    xc = x[:, :, :Ho * pool, :Wo * pool]
    win = xc.reshape(B, C, Ho, pool, Wo, pool).transpose(3, 5, 0, 1, 2, 4)
    win = win.reshape(KK, M).astype(jnp.float32)
    # -inf padding rows: max over KKP rows == max over the KK real rows.
    win = jnp.concatenate(
        [win, jnp.full((KKP - KK, M), -jnp.inf, jnp.float32)], axis=0)

    # Lane tile: whole slab when it comfortably fits VMEM (typical), else 64K lanes.
    if (KKP + 1) * _round_up(M, 128) * 4 <= (12 << 20):
        tl = _round_up(M, 128)
    else:
        tl = 64 * 1024
    Mp = _round_up(M, tl)
    if Mp != M:
        win = jnp.pad(win, ((0, 0), (0, Mp - M)))   # padded cols -> max 0 -> act 0,
                                                    # sliced off below
    slope_arr = jnp.asarray(slope, jnp.float32).reshape(1)

    cost = pl.CostEstimate(flops=(KKP + 1) * M, transcendentals=0,
                           bytes_accessed=(KKP + 1) * Mp * 4)

    out = pl.pallas_call(
        _maxpool_act_kernel,
        out_shape=jax.ShapeDtypeStruct((1, Mp), jnp.float32),
        grid_spec=pltpu.PrefetchScalarGridSpec(
            num_scalar_prefetch=1,
            grid=(Mp // tl,),
            in_specs=[pl.BlockSpec((KKP, tl), lambda i, s: (0, i))],
            out_specs=pl.BlockSpec((1, tl), lambda i, s: (0, i)),
        ),
        compiler_params=pltpu.CompilerParams(
            dimension_semantics=("parallel",),
            vmem_limit_bytes=_maybe_vmem_limit(2 * (KKP + 1) * tl * 4),
        ),
        cost_estimate=cost,
    )(slope_arr, win)

    return out[0, :M].reshape(B, C, Ho, Wo)


# ----------------------------------------------------------------------------
# Plain-JAX references (correctness oracle)
# ----------------------------------------------------------------------------
def _conv_ref(x, w, b, slope):
    y = jax.lax.conv_general_dilated(
        x, w, window_strides=(1, 1), padding="VALID",
        dimension_numbers=("NCHW", "OIHW", "NCHW"))
    y = y + b[None, :, None, None]
    return jnp.where(y > 0, y, slope * y)


def _pool_ref(x, slope):
    y = jax.lax.reduce_window(x, -jnp.inf, jax.lax.max,
                              (1, 1, 3, 3), (1, 1, 3, 3), "VALID")
    return jnp.where(y > 0, y, slope * y)


# ----------------------------------------------------------------------------
# Module equivalent (deterministic synthetic parameters)
# ----------------------------------------------------------------------------
class MyModule2Pallas:
    """JAX/Pallas port of MyModule2: choices={'conv','pool'}, acts={'lrelu','prelu'}."""

    def __init__(self, key):
        kw, kb = jax.random.split(key)
        fan_in = 10 * 3 * 3
        bound = 1.0 / (fan_in ** 0.5)
        # Conv2d(10, 10, 3) parameters (PyTorch-style uniform init, deterministic)
        self.conv_w = jax.random.uniform(kw, (10, 10, 3, 3), jnp.float32, -bound, bound)
        self.conv_b = jax.random.uniform(kb, (10,), jnp.float32, -bound, bound)
        self.lrelu_slope = jnp.float32(0.01)   # nn.LeakyReLU default
        self.prelu_alpha = jnp.float32(0.25)   # nn.PReLU default init

    def __call__(self, x, choice, act):
        slopes = {"lrelu": self.lrelu_slope, "prelu": self.prelu_alpha}
        slope = slopes[act]                    # KeyError on bad key, like ModuleDict
        if choice == "conv":
            # NCHW only for PyTorch parity; downstream JAX consumers should take the
            # NHWC default from conv2d_act_pallas directly (lane-dense, no transpose).
            return conv2d_act_pallas(x, self.conv_w, self.conv_b, slope,
                                     nhwc_output=False)
        if choice == "pool":
            return maxpool_act_pallas(x, slope)
        raise KeyError(choice)


if __name__ == "__main__":
    key = jax.random.PRNGKey(0)
    kx, kp = jax.random.split(key)
    # Conv2d expects 10 input channels; small spatial 16x16, batch 2.
    x = jax.random.normal(kx, (2, 10, 16, 16), jnp.float32)
    model = MyModule2Pallas(kp)

    y_conv_lrelu = jax.block_until_ready(model(x, "conv", "lrelu"))
    y_conv_prelu = jax.block_until_ready(model(x, "conv", "prelu"))
    y_pool_lrelu = jax.block_until_ready(model(x, "pool", "lrelu"))
    y_pool_prelu = jax.block_until_ready(model(x, "pool", "prelu"))

    assert y_conv_lrelu.shape == (2, 10, 14, 14)
    assert y_conv_prelu.shape == (2, 10, 14, 14)
    assert y_pool_lrelu.shape == (2, 10, 5, 5)
    assert y_pool_prelu.shape == (2, 10, 5, 5)

    # Tight check of the kernel math on the f32 path (no bf16 input rounding).
    y_conv_f32 = jax.block_until_ready(
        conv2d_act_pallas(x, model.conv_w, model.conv_b, model.lrelu_slope,
                          use_bf16=False, nhwc_output=False))
    assert jnp.allclose(y_conv_f32,
                        _conv_ref(x, model.conv_w, model.conv_b, model.lrelu_slope),
                        atol=1e-3, rtol=1e-3)

    # Default (bf16-input) path: looser tolerance reflecting bf16 rounding of x / w.
    assert jnp.allclose(y_conv_lrelu,
                        _conv_ref(x, model.conv_w, model.conv_b, model.lrelu_slope),
                        atol=3e-2, rtol=3e-2)
    assert jnp.allclose(y_conv_prelu,
                        _conv_ref(x, model.conv_w, model.conv_b, model.prelu_alpha),
                        atol=3e-2, rtol=3e-2)

    assert jnp.allclose(y_pool_lrelu, _pool_ref(x, model.lrelu_slope),
                        atol=1e-6, rtol=1e-6)
    assert jnp.allclose(y_pool_prelu, _pool_ref(x, model.prelu_alpha),
                        atol=1e-6, rtol=1e-6)

    print("KERNEL_OK")
</pallas_src>

<mosaic_0001>
module attributes {stable_mosaic.version = 11 : i64} {
  func.func @_conv_bias_act_kernel(%arg0: i32, %arg1: memref<1xf32, #tpu.memory_space<smem>>, %arg2: memref<1x16x160xbf16, #tpu.memory_space<vmem>>, %arg3: memref<3x160x140xbf16, #tpu.memory_space<vmem>>, %arg4: memref<1x140xf32, #tpu.memory_space<vmem>>, %arg5: memref<1x14x140xf32, #tpu.memory_space<vmem>>) attributes {dimension_semantics = [#tpu.dimension_semantics<parallel>], iteration_bounds = array<i64: 2>, scalar_prefetch = 1 : i64, scratch_operands = 0 : i64, tpu.core_type = #tpu.core_type<tc>, window_params = [{transform_indices = @transform_0, window_bounds = array<i64: 1, 16, 160>}, {pipeline_mode = #tpu.pipeline_mode<synchronous>, transform_indices = @transform_1, window_bounds = array<i64: 3, 160, 140>}, {pipeline_mode = #tpu.pipeline_mode<synchronous>, transform_indices = @transform_2, window_bounds = array<i64: 1, 140>}, {transform_indices = @transform_3, window_bounds = array<i64: 1, 14, 140>}]} {
    %c0 = arith.constant 0 : index
    %c0_0 = arith.constant 0 : index
    %c0_1 = arith.constant 0 : index
    %0 = vector.load %arg2[%c0, %c0_0, %c0_1] : memref<1x16x160xbf16, #tpu.memory_space<vmem>>, vector<1x14x160xbf16>
    %1 = vector.shape_cast %0 : vector<1x14x160xbf16> to vector<14x160xbf16>
    %c0_2 = arith.constant 0 : index
    %c0_3 = arith.constant 0 : index
    %c0_4 = arith.constant 0 : index
    %2 = vector.load %arg3[%c0_2, %c0_3, %c0_4] : memref<3x160x140xbf16, #tpu.memory_space<vmem>>, vector<1x160x140xbf16>
    %3 = vector.shape_cast %2 : vector<1x160x140xbf16> to vector<160x140xbf16>
    %cst = arith.constant dense<0.000000e+00> : vector<14x140xf32>
    %4 = tpu.matmul %1, %3, %cst {dimension_numbers = #tpu.dot_dimension_numbers<[1], [0], [0], [1], [0, 0, 1, 1], [], []>} : vector<14x160xbf16>, vector<160x140xbf16>, vector<14x140xf32> -> vector<14x140xf32>
    %c0_5 = arith.constant 0 : index
    %c1 = arith.constant 1 : index
    %c0_6 = arith.constant 0 : index
    %5 = vector.load %arg2[%c0_5, %c1, %c0_6] : memref<1x16x160xbf16, #tpu.memory_space<vmem>>, vector<1x14x160xbf16>
    %6 = vector.shape_cast %5 : vector<1x14x160xbf16> to vector<14x160xbf16>
    %c1_7 = arith.constant 1 : index
    %c0_8 = arith.constant 0 : index
    %c0_9 = arith.constant 0 : index
    %7 = vector.load %arg3[%c1_7, %c0_8, %c0_9] : memref<3x160x140xbf16, #tpu.memory_space<vmem>>, vector<1x160x140xbf16>
    %8 = vector.shape_cast %7 : vector<1x160x140xbf16> to vector<160x140xbf16>
    %cst_10 = arith.constant dense<0.000000e+00> : vector<14x140xf32>
    %9 = tpu.matmul %6, %8, %cst_10 {dimension_numbers = #tpu.dot_dimension_numbers<[1], [0], [0], [1], [0, 0, 1, 1], [], []>} : vector<14x160xbf16>, vector<160x140xbf16>, vector<14x140xf32> -> vector<14x140xf32>
    %10 = arith.addf %4, %9 : vector<14x140xf32>
    %c0_11 = arith.constant 0 : index
    %c2 = arith.constant 2 : index
    %c0_12 = arith.constant 0 : index
    %11 = vector.load %arg2[%c0_11, %c2, %c0_12] : memref<1x16x160xbf16, #tpu.memory_space<vmem>>, vector<1x14x160xbf16>
    %12 = vector.shape_cast %11 : vector<1x14x160xbf16> to vector<14x160xbf16>
    %c2_13 = arith.constant 2 : index
    %c0_14 = arith.constant 0 : index
    %c0_15 = arith.constant 0 : index
    %13 = vector.load %arg3[%c2_13, %c0_14, %c0_15] : memref<3x160x140xbf16, #tpu.memory_space<vmem>>, vector<1x160x140xbf16>
    %14 = vector.shape_cast %13 : vector<1x160x140xbf16> to vector<160x140xbf16>
    %cst_16 = arith.constant dense<0.000000e+00> : vector<14x140xf32>
    %15 = tpu.matmul %12, %14, %cst_16 {dimension_numbers = #tpu.dot_dimension_numbers<[1], [0], [0], [1], [0, 0, 1, 1], [], []>} : vector<14x160xbf16>, vector<160x140xbf16>, vector<14x140xf32> -> vector<14x140xf32>
    %16 = arith.addf %10, %15 : vector<14x140xf32>
    %c0_17 = arith.constant 0 : index
    %c0_18 = arith.constant 0 : index
    %17 = vector.load %arg4[%c0_17, %c0_18] : memref<1x140xf32, #tpu.memory_space<vmem>>, vector<1x140xf32>
    %18 = vector.broadcast %17 : vector<1x140xf32> to vector<14x140xf32>
    %19 = arith.addf %16, %18 : vector<14x140xf32>
    %c0_19 = arith.constant 0 : index
    %20 = memref.load %arg1[%c0_19] : memref<1xf32, #tpu.memory_space<smem>>
    %cst_20 = arith.constant 0.000000e+00 : f32
    %21 = vector.broadcast %cst_20 : f32 to vector<14x140xf32>
    %22 = arith.cmpf ogt, %19, %21 : vector<14x140xf32>
    %23 = vector.broadcast %20 : f32 to vector<14x140xf32>
    %24 = arith.mulf %23, %19 : vector<14x140xf32>
    %25 = arith.select %22, %19, %24 : vector<14x140xi1>, vector<14x140xf32>
    %c0_21 = arith.constant 0 : index
    %c0_22 = arith.constant 0 : index
    %c0_23 = arith.constant 0 : index
    %26 = vector.load %arg5[%c0_21, %c0_22, %c0_23] : memref<1x14x140xf32, #tpu.memory_space<vmem>>, vector<1x14x140xf32>
    %27 = vector.shape_cast %26 : vector<1x14x140xf32> to vector<14x140xf32>
    %28 = vector.shape_cast %25 : vector<14x140xf32> to vector<1x14x140xf32>
    tpu.vector_store %arg5[%c0_21, %c0_22, %c0_23], %28 {strides = array<i32>} : memref<1x14x140xf32, #tpu.memory_space<vmem>>, vector<1x14x140xf32>,
    return
  }
  func.func @transform_0(%arg0: i32, %arg1: memref<1xf32, #tpu.memory_space<smem>>) -> (i32, i32, i32) {
    %c0_i32 = arith.constant 0 : i32
    %c0_i32_0 = arith.constant 0 : i32
    %c0_i32_1 = arith.constant 0 : i32
    return %arg0, %c0_i32, %c0_i32_0 : i32, i32, i32
  }
  func.func @transform_1(%arg0: i32, %arg1: memref<1xf32, #tpu.memory_space<smem>>) -> (i32, i32, i32) {
    %c0_i32 = arith.constant 0 : i32
    %c0_i32_0 = arith.constant 0 : i32
    %c0_i32_1 = arith.constant 0 : i32
    %c0_i32_2 = arith.constant 0 : i32
    return %c0_i32, %c0_i32_0, %c0_i32_1 : i32, i32, i32
  }
  func.func @transform_2(%arg0: i32, %arg1: memref<1xf32, #tpu.memory_space<smem>>) -> (i32, i32) {
    %c0_i32 = arith.constant 0 : i32
    %c0_i32_0 = arith.constant 0 : i32
    %c0_i32_1 = arith.constant 0 : i32
    return %c0_i32, %c0_i32_0 : i32, i32
  }
  func.func @transform_3(%arg0: i32, %arg1: memref<1xf32, #tpu.memory_space<smem>>) -> (i32, i32, i32) {
    %c0_i32 = arith.constant 0 : i32
    %c0_i32_0 = arith.constant 0 : i32
    %c0_i32_1 = arith.constant 0 : i32
    return %arg0, %c0_i32, %c0_i32_0 : i32, i32, i32
  }
}

</mosaic_0001>

<bundles_post_ra>
// kernel: tile.8
= control target key start
LH: loop header
LB: loop body
LE: loop exit
PB: predicated region body
PF: predicated region fallthrough
CT: control target
= control target key end

     0   :  { %s28_s0 = inlined_call_operand.vmem [shape: f32[10], index: 0, kind: input, shape index: {}]   ;;  %s29_s1 = inlined_call_operand.vmem [shape: f32[14,10], index: 1, kind: output, shape index: {}]  }
   0x1   :  { %v4_v0 = vld [vmem:[%s28_s0] ss:$0 sm:$0xff] }
   0x2   :  { %5 = vst [vmem:[%s29_s1] sm:$0xff] %v4_v0  ;;  %8 = vst [vmem:[%s29_s1 + $0x8] sm:$0xff] %v4_v0 }

// kernel: tile.9
= control target key start
LH: loop header
LB: loop body
LE: loop exit
PB: predicated region body
PF: predicated region fallthrough
CT: control target
= control target key end

     0   :  { %vm9_vm0 = vcmask 64512   ;;  %s130_s12 = smov 120   ;;  %s131_s13 = smov 100   ;;  %vm3_vm1 = vcmask 80896   ;;  %vm13_vm2 = vcmask 15360   ;;  %vm16_vm3 = vcmask 1048512   ;;  %s204_s0 = inlined_call_operand.vmem [shape: f32[14,10], index: 0, kind: input, shape index: {}]   ;;  %s205_s1 = inlined_call_operand.vmem [shape: f32[1,140], index: 1, kind: output, shape index: {}]  }
   0x1   :  { %v102_v0 = vld [vmem:[%s204_s0 + $0xc] sm:$0x1]   ;;  %v105_v3 = vld [vmem:[%s204_s0 + $0xa] sm:$0x1]   ;;  %v104_v4 = vld [vmem:[%s204_s0 + $0xb] sm:$0x1]  }
   0x2   :  { %v103_v1 = vld [vmem:[%s204_s0 + $0xc] sm:$0x1]   ;;  %26 = vrot.lane.b32.xlu1 %v105_v3, %s131_s13  ;;  %v106_v5 = vld [vmem:[%s204_s0 + $0x9] sm:$0x1]   ;;  %s132_s18 = smov 110   ;;  %s133_s19 = smov 90  }
   0x3   :  { %v10_v2 = vsel %vm9_vm0, %v103_v1, %v102_v0  ;;  %v107_v6 = vld [vmem:[%s204_s0 + $0x8] sm:$0x1]   ;;  %v108_v7 = vld [vmem:[%s204_s0 + $0x7] sm:$0x1]   ;;  %v2_v8 = vld [vmem:[%s204_s0] sm:$0x1]  }
   0x4   :  { %11 = vrot.lane.b32.xlu0 %v10_v2, %s130_s12  ;;  %4 = vst.msk [vmem:[#allocation0] sm:$0x1] %vm3_vm1, %v2_v8   ;;  %s134_s26 = smov 80   ;;  %s135_s27 = smov 70   ;;  %v109_v9 = vld [vmem:[%s204_s0 + $0x6] sm:$0x1]  }
   0x5   :  { %v110_v10 = vld [vmem:[%s204_s0 + $0x5] sm:$0x1]   ;;  %s136_s3 = smov 60   ;;  %s137_s4 = smov 50   ;;  %v111_v11 = vld [vmem:[%s204_s0 + $0x4] sm:$0x1]  }
   0x6   :  { %32 = vrot.lane.b32.xlu1 %v106_v5, %s133_s19  ;;  %v112_v12 = vld [vmem:[%s204_s0 + $0x3] sm:$0x1]   ;;  %s138_s9 = smov 40   ;;  %s139_s10 = smov 30   ;;  %v113_v13 = vld [vmem:[%s204_s0 + $0x2] sm:$0x1]  }
   0x7   :  { %v114_v14 = vld [vmem:[%s204_s0 + $0x1] sm:$0x1]   ;;  %s140_s15 = smov 20   ;;  %s141_s16 = smov 10   ;;  %v115_v15 = vld [vmem:[%s204_s0 + $0xd] sm:$0x1]  }
   0x8   :  { %20 = vrot.lane.b32.xlu0 %v104_v4, %s132_s18  ;;  %s142_s0 = smov 2   ;;  %vm22_vm4 = vcmask 982896   ;;  %vm28_vm5 = vcmask 900896   ;;  %vm34_vm6 = vcmask 818896   ;;  %vm40_vm7 = vcmask 736896  }
   0x9   :  { %vm46_vm8 = vcmask 654896   ;;  %vm52_vm9 = vcmask 572896   ;;  %vm58_vm10 = vcmask 490896   ;;  %vm64_vm11 = vcmask 408896  }
   0xa   :  { %44 = vrot.lane.b32.xlu1 %v108_v7, %s135_s27  ;;  %vm70_vm12 = vcmask 326896   ;;  %vm76_vm13 = vcmask 244896   ;;  %vm82_vm14 = vcmask 162896   ;;  %vm88_vm15 = vcmask 97296  }
   0xc   :  { %38 = vrot.lane.b32.xlu0 %v107_v6, %s134_s26 }
   0xe   :  { %56 = vrot.lane.b32.xlu1 %v110_v10, %s137_s4 }
  0x10   :  { %50 = vrot.lane.b32.xlu0 %v109_v9, %s136_s3 }
  0x12   :  { %68 = vrot.lane.b32.xlu1 %v112_v12, %s139_s10 }
  0x14   :  { %62 = vrot.lane.b32.xlu0 %v111_v11, %s138_s9 }
  0x16   :  { %80 = vrot.lane.b32.xlu1 %v114_v14, %s141_s16 }
  0x18   :  { %74 = vrot.lane.b32.xlu0 %v113_v13, %s140_s15 }
  0x1c   :  { %86 = vrot.lane.b32.xlu0 %v115_v15, %s142_s0 }
  0x74   :  { %v27_v17 = vpop.permute.xlu1 %26  }
  0x76   :  { %v12_v16 = vpop.permute.xlu0 %11  }
  0x77   :  { %15 = vst.msk [vmem:[#allocation0 + $0x8] sm:$0x1] %vm13_vm2, %v12_v16  }
  0x78   :  { %17 = vst.msk [vmem:[#allocation0] sm:$0x1] %vm16_vm3, %v12_v16   ;;  %v33_v19 = vpop.permute.xlu1 %32  }
  0x7a   :  { %v21_v18 = vpop.permute.xlu0 %20  }
  0x7b   :  { %23 = vst.msk [vmem:[#allocation0] sm:$0x1] %vm22_vm4, %v21_v18  }
  0x7c   :  { %29 = vst.msk [vmem:[#allocation0] sm:$0x1] %vm28_vm5, %v27_v17   ;;  %v45_v21 = vpop.permute.xlu1 %44  }
  0x7d   :  { %35 = vst.msk [vmem:[#allocation0] sm:$0x1] %vm34_vm6, %v33_v19  }
  0x7e   :  { %v39_v20 = vpop.permute.xlu0 %38  }
  0x7f   :  { %41 = vst.msk [vmem:[#allocation0] sm:$0x1] %vm40_vm7, %v39_v20  }
  0x80   :  { %47 = vst.msk [vmem:[#allocation0] sm:$0x1] %vm46_vm8, %v45_v21   ;;  %v57_v23 = vpop.permute.xlu1 %56  }
  0x82   :  { %v51_v22 = vpop.permute.xlu0 %50  }
  0x83   :  { %53 = vst.msk [vmem:[#allocation0] sm:$0x1] %vm52_vm9, %v51_v22  }
  0x84   :  { %59 = vst.msk [vmem:[#allocation0] sm:$0x1] %vm58_vm10, %v57_v23   ;;  %v69_v25 = vpop.permute.xlu1 %68  }
  0x86   :  { %v63_v24 = vpop.permute.xlu0 %62  }
  0x87   :  { %65 = vst.msk [vmem:[#allocation0] sm:$0x1] %vm64_vm11, %v63_v24  }
  0x88   :  { %71 = vst.msk [vmem:[#allocation0] sm:$0x1] %vm70_vm12, %v69_v25   ;;  %v81_v27 = vpop.permute.xlu1 %80  }
  0x8a   :  { %v75_v26 = vpop.permute.xlu0 %74  }
  0x8b   :  { %77 = vst.msk [vmem:[#allocation0] sm:$0x1] %vm76_vm13, %v75_v26  }
  0x8c   :  { %83 = vst.msk [vmem:[#allocation0] sm:$0x1] %vm82_vm14, %v81_v27  }
  0x8e   :  { %v87_v28 = vpop.permute.xlu0 %86  }
  0x8f   :  { %90 = vst.msk [vmem:[#allocation0 + $0x8] sm:$0x1] %vm88_vm15, %v87_v28  }
  0x93   :  { %v94_v29 = vld [vmem:[#allocation0] sm:$0x1] }
  0x94   :  { %96 = vst [vmem:[%s205_s1] sm:$0x1] %v94_v29 }
  0x96   :  { %v98_v30 = vld [vmem:[#allocation0 + $0x8] sm:$0x1] }
  0x97   :  { %116 = vst [vmem:[%s205_s1 + $0x1] sm:$0x1] %v98_v30 }

// kernel: conv2d_act_pallas.1
= control target key start
LH: loop header
LB: loop body
LE: loop exit
PB: predicated region body
PF: predicated region fallthrough
CT: control target
= control target key end

     0   :  { %s1081_s17 = smov 0   ;;  %s1310_s0 = inlined_call_operand.<no memory space> [shape: f32[1], index: 0, kind: input, shape index: {}]   ;;  %s1311_s1 = inlined_call_operand.vmem [shape: bf16[2,16,160], index: 1, kind: input, shape index: {}]   ;;  %s1312_s2 = inlined_call_operand.vmem [shape: bf16[3,160,140], index: 2, kind: input, shape index: {}]   ;;  %s1313_s3 = inlined_call_operand.vmem [shape: f32[1,140], index: 3, kind: input, shape index: {}]   ;;  %s1314_s4 = inlined_call_operand.vmem [shape: f32[2,14,140], index: 4, kind: output, shape index: {}]  }
   0x1   :  { %9 = sst [smem:[#allocation3]] %s1310_s0 }
   0x2 LB: > { %s811_s18 = sadd.s32 4294967295, %s1051_s17   ;;  %p815_p0 = scmp.ge.s32.totalorder %s1051_s17, 1  ;;  %s1051_s17 = sphi %s1081_s17, %s15_s17  }
   0x3   : > { %p139_p1 = scmp.lt.s32.totalorder %s1051_s17, 3 }
   0x5   : > { %p140_p2 = pnand %p815_p0, %p139_p1 }
   0x6   : > { %v949_v0 = vld [vmem:[%s1312_s2 + $0x4] ss:$8 sps:$4 sm:$0xff] (!%p140_p2)   ;;  %p163_p3 = scmp.lt.s32.totalorder (!%p140_p2), %s811_s18, 1  ;;  %v951_v1 = vld [vmem:[%s1312_s2] ss:$8 sps:$4 sm:$0xff] (!%p140_p2)   ;;  %vm341_vm0 = vcmask (!%p140_p2), 261120  }
   0x7   : > { %143 = sbr.rel (%p140_p2) target bundleno = 310 (0x136), region = 32  ;;  %497 = vmatprep.subr.bf16.mxu0 (!%p140_p2), %v949_v0  ;;  %v952_v2 = vld [vmem:[%s1312_s2 + $0x14] ss:$8 sps:$4 sm:$0xff] (!%p140_p2)   ;;  %v954_v3 = vld [vmem:[%s1312_s2 + $0x10] ss:$8 sps:$4 sm:$0xff] (!%p140_p2)   ;;  %s736_s20 = sld [smem:[#allocation3]] (!%p140_p2) }
   0x8   : > { %498 = vmatpush1.bf16.msra.mxu0 (!%p140_p2), %v951_v1  ;;  %v955_v4 = vld [vmem:[%s1312_s2 + $0x24] ss:$8 sps:$4 sm:$0xff] (!%p140_p2)   ;;  %v957_v5 = vld [vmem:[%s1312_s2 + $0x20] ss:$8 sps:$4 sm:$0xff] (!%p140_p2)   ;;  %v958_v6 = vld [vmem:[%s1312_s2 + $0x34] ss:$8 sps:$4 sm:$0xff] (!%p140_p2)  }
   0x9   : > { %499 = vmatprep.subr.bf16.mxu0 (!%p140_p2), %v952_v2  ;;  %v960_v7 = vld [vmem:[%s1312_s2 + $0x30] ss:$8 sps:$4 sm:$0xff] (!%p140_p2)   ;;  %v961_v8 = vld [vmem:[%s1312_s2 + $0x44] ss:$8 sps:$4 sm:$0xff] (!%p140_p2)   ;;  %v963_v10 = vld [vmem:[%s1312_s2 + $0x40] ss:$8 sps:$4 sm:$0xff] (!%p140_p2)  }
   0xa   : > { %v978_v9 = vld [vmem:[%s1312_s2 + $0xa4] ss:$8 sps:$4 sm:$0xff] (!%p140_p2)   ;;  %v981_v11 = vld [vmem:[%s1312_s2 + $0xa0] ss:$8 sps:$4 sm:$0xff] (!%p140_p2)   ;;  %v964_v14 = vld [vmem:[%s1312_s2 + $0x54] ss:$8 sps:$4 sm:$0xff] (!%p140_p2)  }
   0xb   : > { %345 = vmatprep.subr.bf16.mxu1 (!%p140_p2), %v978_v9  ;;  %v987_v16 = vld [vmem:[%s1312_s2 + $0xb4] ss:$8 sps:$4 sm:$0xff] (!%p140_p2)   ;;  %v989_v17 = vld [vmem:[%s1312_s2 + $0xb0] ss:$8 sps:$4 sm:$0xff] (!%p140_p2)   ;;  %v967_v19 = vld [vmem:[%s1312_s2 + $0x64] ss:$8 sps:$4 sm:$0xff] (!%p140_p2)  }
   0xc   : > { %500 = vmatpush1.bf16.msra.mxu0 (!%p140_p2), %v954_v3  ;;  %346 = vmatpush1.bf16.msra.mxu1 (!%p140_p2), %v981_v11  ;;  %v966_v18 = vld [vmem:[%s1312_s2 + $0x50] ss:$8 sps:$4 sm:$0xff] (!%p140_p2)   ;;  %v993_v20 = vld [vmem:[%s1312_s2 + $0xc4] ss:$8 sps:$4 sm:$0xff] (!%p140_p2)   ;;  %v995_v21 = vld [vmem:[%s1312_s2 + $0xc0] ss:$8 sps:$4 sm:$0xff] (!%p140_p2)  }
   0xd   : > { %501 = vmatprep.subr.bf16.mxu0 (!%p140_p2), %v955_v4  ;;  %347 = vmatprep.subr.bf16.mxu1 (!%p140_p2), %v987_v16  ;;  %v999_v22 = vld [vmem:[%s1312_s2 + $0xd4] ss:$8 sps:$4 sm:$0xff] (!%p140_p2)   ;;  %v969_v23 = vld [vmem:[%s1312_s2 + $0x60] ss:$8 sps:$4 sm:$0xff] (!%p140_p2)   ;;  %v1001_v25 = vld [vmem:[%s1312_s2 + $0xd0] ss:$8 sps:$4 sm:$0xff] (!%p140_p2)  }
   0xe   : > { %s1316_s18 = smov (!%p163_p3, %s811_s18), 1  ;;  %v970_v24 = vld [vmem:[%s1312_s2 + $0x74] ss:$8 sps:$4 sm:$0xff]   ;;  %v1005_v26 = vld [vmem:[%s1312_s2 + $0xe4] ss:$8 sps:$4 sm:$0xff]   ;;  %vm751_vm3 = vcmask 97280  }
   0xf   : > { %s931_s6 = sshll.u32 %s1316_s18, 4  ;;  %v972_v27 = vld [vmem:[%s1312_s2 + $0x70] ss:$8 sps:$4 sm:$0xff]   ;;  %v973_v28 = vld [vmem:[%s1312_s2 + $0x84] ss:$8 sps:$4 sm:$0xff]   ;;  %s932_s22 = sshll.u32 %s1316_s18, 5 }
  0x10   : > { %502 = vmatpush1.bf16.msra.mxu0 %v957_v5  ;;  %s1119_s11 = scalar_lea.vmem %s1311_s1, %s931_s6  ;;  %348 = vmatpush1.bf16.msra.mxu1 %v989_v17  ;;  %v1007_v29 = vld [vmem:[%s1312_s2 + $0xe0] ss:$8 sps:$4 sm:$0xff]   ;;  %v1011_v30 = vld [vmem:[%s1312_s2 + $0xf4] ss:$8 sps:$4 sm:$0xff]   ;;  %v1013_v33 = vld [vmem:[%s1312_s2 + $0xf0] ss:$8 sps:$4 sm:$0xff]   ;;  %s172_s25 = scalar_lea.vmem %s1314_s4, %s932_s22 }
  0x11   : > { %503 = vmatprep.subr.bf16.mxu0 %v958_v6  ;;  %v1134_v12 = vld [vmem:[%s1119_s11] sm:$0xff]  ;;  %v1137_v13 = vld [vmem:[%s1119_s11 + $0x8] sm:$0x77]  ;;  %349 = vmatprep.subr.bf16.mxu1 %v993_v20  ;;  %v976_v32 = vld [vmem:[%s1312_s2 + $0x94] ss:$8 sps:$4 sm:$0xff]   ;;  %v722_v20 = vlaneseq  ;;  %vm754_vm6 = vcmask 95232  }
  0x12   : > { %v864_v15 = vcombine.high %v1134_v12, %v1137_v13  ;;  %v975_v31 = vld [vmem:[%s1312_s2 + $0x80] ss:$8 sps:$4 sm:$0xff]   ;;  %v1017_v34 = vld [vmem:[%s1312_s2 + $0x104] ss:$8 sps:$4 sm:$0xff]   ;;  %v980_v35 = vld [vmem:[%s1312_s2 + $0x90] ss:$8 sps:$4 sm:$0xff]   ;;  %v863_v39 = vcombine.low %v1134_v12, %v1137_v13 }
  0x13   : > { %v986_v36 = vld [vmem:[%s1312_s2 + $0x144] ss:$8 sps:$4 sm:$0xff]   ;;  %v1019_v37 = vld [vmem:[%s1312_s2 + $0x100] ss:$8 sps:$4 sm:$0xff]   ;;  %v1023_v38 = vld [vmem:[%s1312_s2 + $0x114] ss:$8 sps:$4 sm:$0xff]  }
  0x14   : > { %504 = vmatpush1.bf16.msra.mxu0 %v960_v7  ;;  %885 = vmatprep.mubr.msk.bf16.mxu0 %vm341_vm0, %v864_v15  ;;  %v984_v40 = vld [vmem:[%s1312_s2 + $0x140] ss:$8 sps:$4 sm:$0xff]   ;;  %v992_v42 = vld [vmem:[%s1312_s2 + $0x154] ss:$8 sps:$4 sm:$0xff]   ;;  %v1025_v43 = vld [vmem:[%s1312_s2 + $0x110] ss:$8 sps:$4 sm:$0xff]  }
  0x15   : > { %505 = vmatprep.subr.bf16.mxu0 %v961_v8  ;;  %350 = vmatpush1.bf16.msra.mxu1 %v995_v21  ;;  %v1220_v41 = vld [vmem:[%s1119_s11 + $0x8] sm:$0xff]  ;;  %v540_v47 = vld [vmem:[%s1119_s11] sm:$0xee]  ;;  %v990_v50 = vld [vmem:[%s1312_s2 + $0x150] ss:$8 sps:$4 sm:$0xff]   ;;  %v723_v21 = vshrl.u32 %v722_v20, 7 }
  0x16   : > { %351 = vmatprep.subr.bf16.mxu1 %v999_v22  ;;  %v841_v44 = vcombine.high %v1134_v12, %v1220_v41  ;;  %v840_v45 = vcombine.low %v1134_v12, %v1220_v41  ;;  %v1029_v46 = vld [vmem:[%s1312_s2 + $0x124] ss:$8 sps:$4 sm:$0xff]   ;;  %v907_v52 = vcombine.high %v540_v47, %v1220_v41  ;;  %v1031_v54 = vld [vmem:[%s1312_s2 + $0x120] ss:$8 sps:$4 sm:$0xff]   ;;  %v1035_v56 = vld [vmem:[%s1312_s2 + $0x134] ss:$8 sps:$4 sm:$0xff]   ;;  %v906_v13 = vcombine.low %v540_v47, %v1220_v41 }
  0x17   : > { %v998_v53 = vld [vmem:[%s1312_s2 + $0x164] ss:$8 sps:$4 sm:$0xff]   ;;  %v996_v59 = vld [vmem:[%s1312_s2 + $0x160] ss:$8 sps:$4 sm:$0xff]   ;;  %v1004_v62 = vld [vmem:[%s1312_s2 + $0x174] ss:$8 sps:$4 sm:$0xff]  }
  0x18   : > { %506 = vmatpush1.bf16.msra.mxu0 %v963_v10  ;;  %v234_v48 = vshrl.u32 %v841_v44, 16  ;;  %v236_v49 = vshll.u32 %v841_v44, 16  ;;  %v229_v51 = vshll.u32 %v840_v45, 16  ;;  %v568_v57 = vrot.slane %v907_v52, 1  ;;  %v1037_v63 = vld [vmem:[%s1312_s2 + $0x130] ss:$8 sps:$4 sm:$0xff]  }
  0x19   : > { %507 = vmatprep.subr.bf16.mxu0 %v964_v14  ;;  %352 = vmatpush1.bf16.msra.mxu1 %v1001_v25  ;;  %v227_v60 = vshrl.u32 %v840_v45, 16  ;;  %v1002_v0 = vld [vmem:[%s1312_s2 + $0x170] ss:$8 sps:$4 sm:$0xff]   ;;  %v1010_v2 = vld [vmem:[%s1312_s2 + $0x184] ss:$8 sps:$4 sm:$0xff]   ;;  %v567_v15 = vrot.slane %v906_v13, 1 }
  0x1a   : > { %353 = vmatprep.subr.bf16.mxu1 %v1005_v26  ;;  %v238_v55 = vrot.slane %v236_v49, 1  ;;  %v231_v61 = vrot.slane %v229_v51, 1  ;;  %v1008_v3 = vld [vmem:[%s1312_s2 + $0x180] ss:$8 sps:$4 sm:$0xff]   ;;  %v1016_v4 = vld [vmem:[%s1312_s2 + $0x194] ss:$8 sps:$4 sm:$0xff]  }
  0x1b   : > { %v1014_v5 = vld [vmem:[%s1312_s2 + $0x190] ss:$8 sps:$4 sm:$0xff]   ;;  %v1022_v6 = vld [vmem:[%s1312_s2 + $0x1a4] ss:$8 sps:$4 sm:$0xff]   ;;  %v1020_v7 = vld [vmem:[%s1312_s2 + $0x1a0] ss:$8 sps:$4 sm:$0xff]  }
  0x1c   : > { %508 = vmatpush1.bf16.msra.mxu0 %v966_v18  ;;  %v239_v58 = vor.u32 %v238_v55, %v234_v48  ;;  %v232_v1 = vor.u32 %v231_v61, %v227_v60  ;;  %v1028_v8 = vld [vmem:[%s1312_s2 + $0x1b4] ss:$8 sps:$4 sm:$0xff]   ;;  %v1026_v9 = vld [vmem:[%s1312_s2 + $0x1b0] ss:$8 sps:$4 sm:$0xff]   ;;  %v1034_v10 = vld [vmem:[%s1312_s2 + $0x1c4] ss:$8 sps:$4 sm:$0xff]  }
  0x1d   : > { %509 = vmatprep.subr.bf16.mxu0 %v967_v19  ;;  %354 = vmatpush1.bf16.msra.mxu1 %v1007_v29  ;;  %v1032_v11 = vld [vmem:[%s1312_s2 + $0x1c0] ss:$8 sps:$4 sm:$0xff]   ;;  %v1041_v12 = vld [vmem:[%s1312_s2 + $0x1d4] ss:$8 sps:$4 sm:$0xff]   ;;  %v1039_v14 = vld [vmem:[%s1312_s2 + $0x1d0] ss:$8 sps:$4 sm:$0xff]  }
  0x1e   : > { %355 = vmatprep.subr.bf16.mxu1 %v1011_v30  ;;  %862 = vmatprep.mubr.msk.bf16.mxu1 %vm341_vm0, %v239_v58  ;;  %v724_v22 = vsub.s32 0, %v723_v21  ;;  %v741_v30 = vstv %s736_s20 }
  0x20   : > { %510 = vmatpush1.bf16.msra.mxu0 %v969_v23  ;;  %v720_v23 = vld [vmem:[%s1313_s3] sm:$0x3] }
  0x21   : > { %511 = vmatprep.subr.bf16.mxu0 %v970_v24  ;;  %356 = vmatpush1.bf16.msra.mxu1 %v1013_v33  ;;  %v728_v24 = vsub.s32 1, %v723_v21  ;;  %v725_v25 = vrot.slane %v720_v23, %v724_v22 }
  0x22   : > { %357 = vmatprep.subr.bf16.mxu1 %v1017_v34 }
  0x24   : > { %512 = vmatpush1.bf16.msra.mxu0 %v972_v27  ;;  %v729_v27 = vrot.slane %v720_v23, %v728_v24 }
  0x25   : > { %513 = vmatprep.subr.bf16.mxu0 %v973_v28  ;;  %358 = vmatpush1.bf16.msra.mxu1 %v1019_v37 }
  0x26   : > { %359 = vmatprep.subr.bf16.mxu1 %v1023_v38 }
  0x28   : > { %514 = vmatpush1.bf16.msra.mxu0 %v975_v31 }
  0x29   : > { %515 = vmatprep.subr.bf16.mxu0 %v976_v32  ;;  %360 = vmatpush1.bf16.msra.mxu1 %v1025_v43 }
  0x2a   : > { %361 = vmatprep.subr.bf16.mxu1 %v1029_v46 }
  0x2c   : > { %516 = vmatpush1.bf16.msra.mxu0 %v980_v35 }
  0x2d   : > { %673 = vmatprep.subr.bf16.mxu0 %v986_v36  ;;  %362 = vmatpush1.bf16.msra.mxu1 %v1031_v54 }
  0x2e   : > { %363 = vmatprep.subr.bf16.mxu1 %v1035_v56 }
  0x2f   : > { %530 = vmatmul.mubr.bf16.vlgmr.msra.gmra.mrb[0].mxu0 %v863_v39 }
  0x30   : > { %674 = vmatpush1.bf16.msra.mxu0 %v984_v40  ;;  %928 = vmatprep.mubr.msk.bf16.mxu0 %vm341_vm0, %v568_v57 }
  0x31   : > { %675 = vmatprep.subr.bf16.mxu0 %v992_v42  ;;  %364 = vmatpush1.bf16.msra.mxu1 %v1037_v63 }
  0x34   : > { %676 = vmatpush1.bf16.msra.mxu0 %v990_v50  ;;  %378 = vmatmul.mubr.bf16.vlgmr.msra.gmra.mrb[0].mxu1 %v232_v1 }
  0x35   : > { %677 = vmatprep.subr.bf16.mxu0 %v998_v53 }
  0x38   : > { %678 = vmatpush1.bf16.msra.mxu0 %v996_v59 }
  0x39   : > { %679 = vmatprep.subr.bf16.mxu0 %v1004_v62 }
  0x3c   : > { %680 = vmatpush1.bf16.msra.mxu0 %v1002_v0 }
  0x3d   : > { %681 = vmatprep.subr.bf16.mxu0 %v1010_v2 }
  0x40   : > { %682 = vmatpush1.bf16.msra.mxu0 %v1008_v3 }
  0x41   : > { %683 = vmatprep.subr.bf16.mxu0 %v1016_v4 }
  0x44   : > { %684 = vmatpush1.bf16.msra.mxu0 %v1014_v5 }
  0x45   : > { %685 = vmatprep.subr.bf16.mxu0 %v1022_v6 }
  0x48   : > { %686 = vmatpush1.bf16.msra.mxu0 %v1020_v7 }
  0x49   : > { %687 = vmatprep.subr.bf16.mxu0 %v1028_v8 }
  0x4c   : > { %688 = vmatpush1.bf16.msra.mxu0 %v1026_v9 }
  0x4d   : > { %689 = vmatprep.subr.bf16.mxu0 %v1034_v10 }
  0x50   : > { %690 = vmatpush1.bf16.msra.mxu0 %v1032_v11 }
  0x51   : > { %691 = vmatprep.subr.bf16.mxu0 %v1041_v12 }
  0x54   : > { %692 = vmatpush1.bf16.msra.mxu0 %v1039_v14 }
  0x57   : > { %706 = vmatmul.mubr.bf16.vlgmr.msra.gmra.mrb[0].mxu0 %v567_v15 }
 0x107   : > { %v379_v16 = vpop.f32.mrb[0].mxu1 }
 0x108   : > { %v381_v17 = vpop.f32.mrb[1].mxu1 }
 0x109   : > { %v383_v18 = vpop.f32.mrb[2].mxu1 }
 0x10a   : > { %v385_v19 = vpop.f32.mrb[3].mxu1 }
 0x12a   : > { %v707_v26 = vpop.f32.mrb[0].mxu0 }
 0x12b   : > { %v933_v28 = vadd.f32 %v707_v26, %v379_v16  ;;  %v709_v29 = vpop.f32.mrb[1].mxu0 }
 0x12c   : > { %v934_v31 = vadd.f32 %v709_v29, %v381_v17  ;;  %v711_v32 = vpop.f32.mrb[2].mxu0 }
 0x12d   : > { %v732_v33 = vadd.f32 %v933_v28, %v725_v25  ;;  %v935_v34 = vadd.f32 %v711_v32, %v383_v18  ;;  %v713_v35 = vpop.f32.mrb[3].mxu0 }
 0x12e   : > { %v733_v36 = vadd.f32 %v934_v31, %v729_v27  ;;  %v936_v37 = vadd.f32 %v713_v35, %v385_v19 }
 0x12f   : > { %vm737_vm1 = vcmp.gt.f32.partialorder %v732_v33, 0.0  ;;  %v742_v38 = vmul.f32 %v741_v30, %v732_v33  ;;  %v734_v39 = vadd.f32 %v935_v34, %v725_v25 }
 0x130   : > { %vm738_vm2 = vcmp.gt.f32.partialorder %v733_v36, 0.0  ;;  %v743_v40 = vmul.f32 %v741_v30, %v733_v36  ;;  %v735_v41 = vadd.f32 %v936_v37, %v729_v27 }
 0x131   : > { %v746_v42 = vsel %vm737_vm1, %v732_v33, %v742_v38  ;;  %vm739_vm4 = vcmp.gt.f32.partialorder %v734_v39, 0.0  ;;  %v744_v43 = vmul.f32 %v741_v30, %v734_v39 }
 0x132   : > { %750 = vst [vmem:[%s172_s25] sm:$0xff] %v746_v42  ;;  %v747_v44 = vsel %vm738_vm2, %v733_v36, %v743_v40  ;;  %vm740_vm5 = vcmp.gt.f32.partialorder %v735_v41, 0.0  ;;  %v745_v45 = vmul.f32 %v741_v30, %v735_v41 }
 0x133   : > { %752 = vst.msk [vmem:[%s172_s25 + $0x8] sm:$0xff] %vm751_vm3, %v747_v44  ;;  %v748_v46 = vsel %vm739_vm4, %v734_v39, %v744_v43 }
 0x134   : > { %753 = vst [vmem:[%s172_s25 + $0x10] sm:$0x3f] %v748_v46  ;;  %v749_v47 = vsel %vm740_vm5, %v735_v41, %v745_v45 }
 0x135   : > { %755 = vst.msk [vmem:[%s172_s25 + $0x18] sm:$0x3f] %vm754_vm6, %v749_v47 }
 0x136 PF: > { %s15_s17 = sadd.s32 1, %s1051_s17  }
 0x137   : > { %p12_p4 = scmp.ge.s32.totalorder %s15_s17, 4  }
 0x139   :  { %14 = sbr.rel (!%p12_p4) target bundleno = 2 (0x2), region = 64 }

</bundles_post_ra>
